<compile_context>
chip_gen: v5e
topology: v5e:2x2
jax: 0.10.0
libtpu: 0.0.40
codegen_flags: <defaults>
</compile_context>

<pallas_src>
import functools

import jax
import jax.numpy as jnp
from jax.experimental import pallas as pl
from jax.experimental.pallas import tpu as pltpu


_TILE = 512   # row/col tile once graphs outgrow a single block
_LANE = 128


def _round_up(x, m):
    return ((x + m - 1) // m) * m


try:
    _VMEM_CAP = int(pltpu.get_tpu_info().vmem_capacity_bytes)
except Exception:  # pragma: no cover - fall back to v5e/v6e physical size
    _VMEM_CAP = 128 * 1024 * 1024
# ~96 MiB on v5e/v6e (128 MiB physical); ~48 MiB on v7x (64 MiB physical).
_VMEM_LIMIT = int(min(96 * 1024 * 1024, int(0.75 * _VMEM_CAP)))


# ----------------------------------------------------------------------------
# Pallas kernel:  acc = A @ M  (bf16 inputs, f32 accumulation)
#   ax_first  (F <= H): M = dinv_s*X,       finalize: (dinv_t*acc) @ W + b
#   !ax_first (F >  H): M = (dinv_s*X) @ W, finalize:  dinv_t*acc      + b
# ----------------------------------------------------------------------------
def _make_gcn_kernel(ax_first: bool, tk: int):
    if ax_first:
        def kernel(a_ref, m_ref, ddst_ref, w_ref, b_ref, o_ref, acc_ref):
            k = pl.program_id(2)

            @pl.when(k == 0)
            def _init():
                acc_ref[...] = jnp.zeros_like(acc_ref)

            off = pl.multiple_of(k * tk, tk)
            acc_ref[...] += jnp.dot(a_ref[...], m_ref[pl.ds(off, tk), :],
                                    preferred_element_type=jnp.float32)

            @pl.when(k == pl.num_programs(2) - 1)
            def _finalize():
                scaled = ddst_ref[...] * acc_ref[...]          # dinv_t row scale
                y = jnp.dot(scaled, w_ref[...],
                            preferred_element_type=jnp.float32)
                o_ref[...] = (y + b_ref[...]).astype(o_ref.dtype)
    else:
        def kernel(a_ref, m_ref, ddst_ref, b_ref, o_ref, acc_ref):
            k = pl.program_id(2)

            @pl.when(k == 0)
            def _init():
                acc_ref[...] = jnp.zeros_like(acc_ref)

            off = pl.multiple_of(k * tk, tk)
            acc_ref[...] += jnp.dot(a_ref[...], m_ref[pl.ds(off, tk), :],
                                    preferred_element_type=jnp.float32)

            @pl.when(k == pl.num_programs(2) - 1)
            def _finalize():
                o_ref[...] = (ddst_ref[...] * acc_ref[...]
                              + b_ref[...]).astype(o_ref.dtype)

    return kernel


def _gcn_hetero_pallas(a, m, ddst, w, b, *, ax_first, tm, tk):
    """a:(E,Np,Np) bf16 raw adj, m:(E,Np,C) bf16, ddst:(E,Np,1) f32,
    w:(E,Fp,Hp) f32 (used only when ax_first), b:(E,1,Hp) f32."""
    e_num, n_pad, _ = a.shape
    m_cols = m.shape[-1]
    h_pad = b.shape[-1]
    n_i = n_pad // tm
    n_k = n_pad // tk
    sq = pl.Squeezed()

    in_specs = [
        pl.BlockSpec((sq, tm, tk), lambda e, i, k: (e, i, k)),         # A tile
        pl.BlockSpec((sq, n_pad, m_cols), lambda e, i, k: (e, 0, 0)),  # M resident / edge type
        pl.BlockSpec((sq, tm, 1), lambda e, i, k: (e, i, 0)),          # dinv (dst rows)
    ]
    args = [a, m, ddst]
    if ax_first:
        in_specs.append(pl.BlockSpec((sq, m_cols, h_pad), lambda e, i, k: (e, 0, 0)))  # W
        args.append(w)
    in_specs.append(pl.BlockSpec((sq, 1, h_pad), lambda e, i, k: (e, 0, 0)))           # bias
    args.append(b)

    # TODO(synk): pipeline_mode=pl.Buffered(1) on M/W/bias (block index changes
    # only with the slow e axis) would reclaim VMEM on v7x; kept default
    # double-buffering for compile robustness.
    return pl.pallas_call(
        _make_gcn_kernel(ax_first, tk),
        out_shape=jax.ShapeDtypeStruct((e_num, n_pad, h_pad), jnp.float32),
        grid_spec=pltpu.PrefetchScalarGridSpec(
            num_scalar_prefetch=0,
            grid=(e_num, n_i, n_k),
            in_specs=in_specs,
            out_specs=pl.BlockSpec((sq, tm, h_pad), lambda e, i, k: (e, i, 0)),
            scratch_shapes=[pltpu.VMEM((tm, m_cols), jnp.float32)],
        ),
        compiler_params=pltpu.CompilerParams(
            dimension_semantics=("parallel", "parallel", "arbitrary"),
            vmem_limit_bytes=_VMEM_LIMIT,
        ),
    )(*args)


# ----------------------------------------------------------------------------
# JAX glue: dense adjacency with PyG self-loop semantics + D^-1/2 vector
# ----------------------------------------------------------------------------
def _dense_adj_and_dinv(edge_index, edge_weight, num_nodes, n_pad):
    src = edge_index[0].astype(jnp.int32)
    tgt = edge_index[1].astype(jnp.int32)
    w = edge_weight.astype(jnp.float32)
    num_edges = int(src.shape[0])

    adj = jnp.zeros((n_pad, n_pad), jnp.float32)
    diag_idx = jnp.arange(n_pad, dtype=jnp.int32)
    valid = diag_idx < num_nodes

    if num_edges > 0:
        is_loop = src == tgt
        # Non-self-loop edges: scatter-add (parallel edges sum, as in message passing).
        adj = adj.at[tgt, src].add(jnp.where(is_loop, 0.0, w), mode="drop")
        # PyG add_remaining_self_loops: existing self-loops are replaced by one
        # self-loop per node carrying the existing weight (last write wins for
        # duplicates); nodes without one get fill_value = 1.
        order = jnp.arange(num_edges, dtype=jnp.int32)
        loop_node = jnp.where(is_loop, tgt, n_pad)          # OOB for non-loops -> dropped
        last_pos = (
            jnp.full((n_pad,), -1, jnp.int32).at[loop_node].max(order, mode="drop")
        )
        has_loop = last_pos >= 0
        diag_w = jnp.where(has_loop, w[jnp.maximum(last_pos, 0)], 1.0)
    else:
        diag_w = jnp.ones((n_pad,), jnp.float32)

    diag_w = jnp.where(valid, diag_w, 0.0)
    adj = adj.at[diag_idx, diag_idx].add(diag_w)

    deg = adj.sum(axis=1)                                    # incoming-weight degree
    dinv = jnp.where(deg > 0.0, jax.lax.rsqrt(deg), 0.0)
    return adj, dinv[:, None]


@functools.partial(jax.jit, static_argnames=("hidden_dim",))
def _hetero_gcn_forward(w_stack, b_stack, xs, eis, ews, *, hidden_dim):
    """One fused, jitted forward over all edge types (one pallas_call)."""
    n_list = [int(x.shape[0]) for x in xs]
    e_num = len(n_list)
    f_pad = w_stack.shape[1]
    h_pad = w_stack.shape[2]
    n_max = max(n_list)
    if n_max <= _TILE:
        n_pad = _round_up(max(n_max, 1), _LANE)   # lane-dense single tile
        tm = tk = n_pad
    else:
        n_pad = _round_up(n_max, _TILE)
        tm = tk = _TILE

    ax_first = f_pad <= h_pad                     # (A@X)@W when feature dim is smaller
    m_cols = f_pad if ax_first else h_pad

    # Build per-edge-type operands directly into preallocated stacked buffers
    # (no extra jnp.stack copy). A and M go to bf16: halves the dominant HBM
    # stream and runs the MXU at native bf16 rate; f32 accumulation in-kernel.
    a_all = jnp.zeros((e_num, n_pad, n_pad), jnp.bfloat16)
    m_all = jnp.zeros((e_num, n_pad, m_cols), jnp.bfloat16)
    d_all = jnp.zeros((e_num, n_pad, 1), jnp.float32)
    for e, (x, ei, ew, n) in enumerate(zip(xs, eis, ews, n_list)):
        adj, dinv = _dense_adj_and_dinv(ei, ew, n, n_pad)
        xp = jnp.zeros((n_pad, f_pad), jnp.float32).at[:n, : x.shape[1]].set(
            x.astype(jnp.float32)
        )
        xs_norm = dinv * xp                       # fold dinv_src once, O(N*F)
        if ax_first:
            m_e = xs_norm
        else:
            # Hoist X @ W out of the kernel's inner loop: once per edge type.
            m_e = jnp.dot(xs_norm, w_stack[e], preferred_element_type=jnp.float32)
        a_all = a_all.at[e].set(adj.astype(jnp.bfloat16))
        m_all = m_all.at[e].set(m_e.astype(jnp.bfloat16))
        d_all = d_all.at[e].set(dinv)

    out = _gcn_hetero_pallas(a_all, m_all, d_all, w_stack, b_stack,
                             ax_first=ax_first, tm=tm, tk=tk)
    return tuple(out[e, :n, :hidden_dim] for e, n in enumerate(n_list))


# ----------------------------------------------------------------------------
# Module
# ----------------------------------------------------------------------------
class ReconstructorHGNN:
    """JAX/Pallas reimplementation of the PyTorch ReconstructorHGNN module."""

    def __init__(self, meta_data, hidden_dim, out_dim, in_dims, key):
        self.meta_data = meta_data
        self.hidden_dim = hidden_dim
        self.out_dim = out_dim  # unused in forward (matches the torch module)
        self.edge_types = list(meta_data[1])

        self.params = {}
        for et in self.edge_types:
            src_type = et[0]
            key, wk = jax.random.split(key)
            in_dim = in_dims[src_type]
            # GCNConv: glorot-initialized Linear(in, hidden, bias=False) + zero bias.
            limit = (6.0 / (in_dim + hidden_dim)) ** 0.5
            w = jax.random.uniform(wk, (in_dim, hidden_dim), jnp.float32, -limit, limit)
            b = jnp.zeros((1, hidden_dim), jnp.float32)
            self.params[et] = (w, b)

        # Pre-pad & stack parameters once: lane-dense H (multiple of 128); F is
        # padded to 128 only when it's non-trivial (>= 64), else to 8 (the
        # kernel is A-bandwidth-bound there and extra X/W bytes don't pay).
        self.h_pad = _round_up(hidden_dim, 128)
        max_in = max(in_dims[et[0]] for et in self.edge_types)
        self.f_pad = _round_up(max_in, 128) if max_in >= 64 else _round_up(max_in, 8)
        w_l, b_l = [], []
        for et in self.edge_types:
            w, b = self.params[et]
            wp = jnp.zeros((self.f_pad, self.h_pad), jnp.float32)
            wp = wp.at[: w.shape[0], :hidden_dim].set(w)
            bp = jnp.zeros((1, self.h_pad), jnp.float32).at[:, :hidden_dim].set(b)
            w_l.append(wp)
            b_l.append(bp)
        self.w_stack = jnp.stack(w_l)  # (E, Fp, Hp)
        self.b_stack = jnp.stack(b_l)  # (E, 1, Hp)

    def __call__(self, x_dict, edge_index_dict, edge_weight_dict):
        xs = tuple(x_dict[et[0]] for et in self.edge_types)
        eis = tuple(edge_index_dict[et] for et in self.edge_types)
        ews = tuple(edge_weight_dict[et] for et in self.edge_types)
        outs = _hetero_gcn_forward(
            self.w_stack, self.b_stack, xs, eis, ews, hidden_dim=self.hidden_dim
        )
        out_dict = {}
        for et, y in zip(self.edge_types, outs):
            dst = et[2]
            # HeteroConv(aggr='sum')
            out_dict[dst] = out_dict[dst] + y if dst in out_dict else y
        return out_dict


# ----------------------------------------------------------------------------
# Demo / self-check
# ----------------------------------------------------------------------------
if __name__ == "__main__":
    key = jax.random.PRNGKey(0)

    categories = ["education", "gaming", "tools", "social", "health"]
    num_nodes = {"education": 8, "gaming": 6, "tools": 7, "social": 8, "health": 5}
    feat_dim = 8
    hidden_dim = 32
    edge_types = [(c, "connected_to", c) for c in categories]
    meta_data = (categories, edge_types)

    # Synthetic heterogeneous graph (deterministic), mirroring create_hetero_data.
    x_dict, edge_index_dict, edge_weight_dict = {}, {}, {}
    for c in categories:
        key, kx, ke, kw = jax.random.split(key, 4)
        n = num_nodes[c]
        x_dict[c] = jax.random.normal(kx, (n, feat_dim), dtype=jnp.float32)
        n_edges = 2 * n
        ei = jax.random.randint(ke, (2, n_edges), 0, n, dtype=jnp.int32)
        ew = jax.random.randint(kw, (n_edges,), 1, 20).astype(jnp.float32)
        edge_index_dict[(c, "connected_to", c)] = ei
        edge_weight_dict[(c, "connected_to", c)] = ew

    in_dims = {c: feat_dim for c in categories}
    key, pk = jax.random.split(key)
    model = ReconstructorHGNN(
        meta_data, hidden_dim, out_dim=hidden_dim, in_dims=in_dims, key=pk
    )

    out = model(x_dict, edge_index_dict, edge_weight_dict)
    for c in categories:
        jax.block_until_ready(out[c])
        assert out[c].shape == (num_nodes[c], hidden_dim)

    # Pure-JAX dense reference (A_hat @ X @ W + b) at HIGHEST precision.
    hi = jax.lax.Precision.HIGHEST
    for c in categories:
        et = (c, "connected_to", c)
        w, b = model.params[et]
        n = num_nodes[c]
        adj, dinv = _dense_adj_and_dinv(edge_index_dict[et], edge_weight_dict[et], n, n)
        a_hat = dinv * adj * dinv[:, 0][None, :]
        ref = jnp.dot(a_hat, jnp.dot(x_dict[c], w, precision=hi), precision=hi) + b
        assert jnp.allclose(out[c], ref, atol=5e-2, rtol=5e-2), f"mismatch for {c}"

    print("KERNEL_OK")
</pallas_src>

<mosaic_0001>
module attributes {stable_mosaic.version = 11 : i64} {
  func.func @kernel(%arg0: i32, %arg1: i32, %arg2: i32, %arg3: memref<1x128x128xbf16, #tpu.memory_space<vmem>>, %arg4: memref<1x128x8xbf16, #tpu.memory_space<vmem>>, %arg5: memref<1x128x1xf32, #tpu.memory_space<vmem>>, %arg6: memref<1x8x128xf32, #tpu.memory_space<vmem>>, %arg7: memref<1x1x128xf32, #tpu.memory_space<vmem>>, %arg8: memref<1x128x128xf32, #tpu.memory_space<vmem>>, %arg9: memref<128x8xf32, #tpu.memory_space<vmem>>) attributes {dimension_semantics = [#tpu.dimension_semantics<parallel>, #tpu.dimension_semantics<parallel>, #tpu.dimension_semantics<arbitrary>], iteration_bounds = array<i64: 5, 1, 1>, scalar_prefetch = 0 : i64, scratch_operands = 1 : i64, tpu.core_type = #tpu.core_type<tc>, window_params = [{transform_indices = @transform_0, window_bounds = array<i64: 1, 128, 128>}, {transform_indices = @transform_1, window_bounds = array<i64: 1, 128, 8>}, {transform_indices = @transform_2, window_bounds = array<i64: 1, 128, 1>}, {transform_indices = @transform_3, window_bounds = array<i64: 1, 8, 128>}, {transform_indices = @transform_4, window_bounds = array<i64: 1, 1, 128>}, {transform_indices = @transform_5, window_bounds = array<i64: 1, 128, 128>}]} {
    %c0_i32 = arith.constant 0 : i32
    %0 = arith.cmpi eq, %arg2, %c0_i32 : i32
    %1 = arith.extui %0 : i1 to i32
    %c0_i32_0 = arith.constant 0 : i32
    %2 = arith.cmpi ne, %1, %c0_i32_0 : i32
    scf.if %2 {
      %cst_11 = arith.constant 0.000000e+00 : f32
      %17 = vector.broadcast %cst_11 : f32 to vector<128x8xf32>
      %c0_12 = arith.constant 0 : index
      %c0_13 = arith.constant 0 : index
      %18 = vector.load %arg9[%c0_12, %c0_13] : memref<128x8xf32, #tpu.memory_space<vmem>>, vector<128x8xf32>
      tpu.vector_store %arg9[%c0_12, %c0_13], %17 {strides = array<i32>} : memref<128x8xf32, #tpu.memory_space<vmem>>, vector<128x8xf32>,
    } else {
    }
    %c128_i32 = arith.constant 128 : i32
    %3 = arith.muli %arg2, %c128_i32 : i32
    %4 = tpu.assume_multiple %3, 128 : i32
    %c0 = arith.constant 0 : index
    %c0_1 = arith.constant 0 : index
    %5 = vector.load %arg9[%c0, %c0_1] : memref<128x8xf32, #tpu.memory_space<vmem>>, vector<128x8xf32>
    %c0_2 = arith.constant 0 : index
    %c0_3 = arith.constant 0 : index
    %c0_4 = arith.constant 0 : index
    %6 = vector.load %arg3[%c0_2, %c0_3, %c0_4] : memref<1x128x128xbf16, #tpu.memory_space<vmem>>, vector<1x128x128xbf16>
    %7 = vector.shape_cast %6 : vector<1x128x128xbf16> to vector<128x128xbf16>
    %c0_5 = arith.constant 0 : index
    %8 = arith.index_cast %4 : i32 to index
    %c0_6 = arith.constant 0 : index
    %9 = vector.load %arg4[%c0_5, %8, %c0_6] : memref<1x128x8xbf16, #tpu.memory_space<vmem>>, vector<1x128x8xbf16>
    %10 = vector.shape_cast %9 : vector<1x128x8xbf16> to vector<128x8xbf16>
    %cst = arith.constant dense<0.000000e+00> : vector<128x8xf32>
    %11 = tpu.matmul %7, %10, %cst {dimension_numbers = #tpu.dot_dimension_numbers<[1], [0], [0], [1], [0, 0, 1, 1], [], []>} : vector<128x128xbf16>, vector<128x8xbf16>, vector<128x8xf32> -> vector<128x8xf32>
    %12 = arith.addf %5, %11 : vector<128x8xf32>
    %c0_7 = arith.constant 0 : index
    %c0_8 = arith.constant 0 : index
    %13 = vector.load %arg9[%c0_7, %c0_8] : memref<128x8xf32, #tpu.memory_space<vmem>>, vector<128x8xf32>
    tpu.vector_store %arg9[%c0_7, %c0_8], %12 {strides = array<i32>} : memref<128x8xf32, #tpu.memory_space<vmem>>, vector<128x8xf32>,
    %c0_i32_9 = arith.constant 0 : i32
    %14 = arith.cmpi eq, %arg2, %c0_i32_9 : i32
    %15 = arith.extui %14 : i1 to i32
    %c0_i32_10 = arith.constant 0 : i32
    %16 = arith.cmpi ne, %15, %c0_i32_10 : i32
    scf.if %16 {
      %c0_11 = arith.constant 0 : index
      %c0_12 = arith.constant 0 : index
      %c0_13 = arith.constant 0 : index
      %17 = vector.load %arg5[%c0_11, %c0_12, %c0_13] : memref<1x128x1xf32, #tpu.memory_space<vmem>>, vector<1x128x1xf32>
      %18 = vector.shape_cast %17 : vector<1x128x1xf32> to vector<128x1xf32>
      %c0_14 = arith.constant 0 : index
      %c0_15 = arith.constant 0 : index
      %19 = vector.load %arg9[%c0_14, %c0_15] : memref<128x8xf32, #tpu.memory_space<vmem>>, vector<128x8xf32>
      %20 = vector.broadcast %18 : vector<128x1xf32> to vector<128x8xf32>
      %21 = arith.mulf %20, %19 : vector<128x8xf32>
      %c0_16 = arith.constant 0 : index
      %c0_17 = arith.constant 0 : index
      %c0_18 = arith.constant 0 : index
      %22 = vector.load %arg6[%c0_16, %c0_17, %c0_18] : memref<1x8x128xf32, #tpu.memory_space<vmem>>, vector<1x8x128xf32>
      %23 = vector.shape_cast %22 : vector<1x8x128xf32> to vector<8x128xf32>
      %cst_19 = arith.constant dense<0.000000e+00> : vector<128x128xf32>
      %24 = tpu.matmul %21, %23, %cst_19 {dimension_numbers = #tpu.dot_dimension_numbers<[1], [0], [0], [1], [0, 0, 1, 1], [], []>} : vector<128x8xf32>, vector<8x128xf32>, vector<128x128xf32> -> vector<128x128xf32>
      %c0_20 = arith.constant 0 : index
      %c0_21 = arith.constant 0 : index
      %c0_22 = arith.constant 0 : index
      %25 = vector.load %arg7[%c0_20, %c0_21, %c0_22] : memref<1x1x128xf32, #tpu.memory_space<vmem>>, vector<1x1x128xf32>
      %26 = vector.shape_cast %25 : vector<1x1x128xf32> to vector<1x128xf32>
      %27 = vector.broadcast %26 : vector<1x128xf32> to vector<128x128xf32>
      %28 = arith.addf %24, %27 : vector<128x128xf32>
      %c0_23 = arith.constant 0 : index
      %c0_24 = arith.constant 0 : index
      %c0_25 = arith.constant 0 : index
      %29 = vector.load %arg8[%c0_23, %c0_24, %c0_25] : memref<1x128x128xf32, #tpu.memory_space<vmem>>, vector<1x128x128xf32>
      %30 = vector.shape_cast %29 : vector<1x128x128xf32> to vector<128x128xf32>
      %31 = vector.shape_cast %28 : vector<128x128xf32> to vector<1x128x128xf32>
      tpu.vector_store %arg8[%c0_23, %c0_24, %c0_25], %31 {strides = array<i32>} : memref<1x128x128xf32, #tpu.memory_space<vmem>>, vector<1x128x128xf32>,
    } else {
    }
    return
  }
  func.func @transform_0(%arg0: i32, %arg1: i32, %arg2: i32) -> (i32, i32, i32) {
    %c0_i32 = arith.constant 0 : i32
    return %arg0, %arg1, %arg2 : i32, i32, i32
  }
  func.func @transform_1(%arg0: i32, %arg1: i32, %arg2: i32) -> (i32, i32, i32) {
    %c0_i32 = arith.constant 0 : i32
    %c0_i32_0 = arith.constant 0 : i32
    %c0_i32_1 = arith.constant 0 : i32
    return %arg0, %c0_i32, %c0_i32_0 : i32, i32, i32
  }
  func.func @transform_2(%arg0: i32, %arg1: i32, %arg2: i32) -> (i32, i32, i32) {
    %c0_i32 = arith.constant 0 : i32
    %c0_i32_0 = arith.constant 0 : i32
    return %arg0, %arg1, %c0_i32 : i32, i32, i32
  }
  func.func @transform_3(%arg0: i32, %arg1: i32, %arg2: i32) -> (i32, i32, i32) {
    %c0_i32 = arith.constant 0 : i32
    %c0_i32_0 = arith.constant 0 : i32
    %c0_i32_1 = arith.constant 0 : i32
    return %arg0, %c0_i32, %c0_i32_0 : i32, i32, i32
  }
  func.func @transform_4(%arg0: i32, %arg1: i32, %arg2: i32) -> (i32, i32, i32) {
    %c0_i32 = arith.constant 0 : i32
    %c0_i32_0 = arith.constant 0 : i32
    %c0_i32_1 = arith.constant 0 : i32
    return %arg0, %c0_i32, %c0_i32_0 : i32, i32, i32
  }
  func.func @transform_5(%arg0: i32, %arg1: i32, %arg2: i32) -> (i32, i32, i32) {
    %c0_i32 = arith.constant 0 : i32
    %c0_i32_0 = arith.constant 0 : i32
    return %arg0, %arg1, %c0_i32 : i32, i32, i32
  }
}

</mosaic_0001>

<bundles_post_ra>
// kernel: _hetero_gcn_forward.1
= control target key start
LH: loop header
LB: loop body
LE: loop exit
PB: predicated region body
PF: predicated region fallthrough
CT: control target
= control target key end

     0   :  { %s1251_s18 = smov 0   ;;  %s1253_s19 = smov 0   ;;  %s1419_s0 = inlined_call_operand.vmem [shape: bf16[5,128,128], index: 0, kind: input, shape index: {}]   ;;  %s1420_s1 = inlined_call_operand.vmem [shape: bf16[5,128,8], index: 1, kind: input, shape index: {}]   ;;  %s1421_s2 = inlined_call_operand.vmem [shape: f32[5,128,1], index: 2, kind: input, shape index: {}]   ;;  %s1422_s3 = inlined_call_operand.vmem [shape: f32[5,8,128], index: 3, kind: input, shape index: {}]   ;;  %s1423_s4 = inlined_call_operand.vmem [shape: f32[5,1,128], index: 4, kind: input, shape index: {}]   ;;  %s1424_s5 = inlined_call_operand.vmem [shape: f32[5,128,128], index: 5, kind: output, shape index: {}]  }
   0x1   :  { %s1255_s20 = smov 0  }
   0x2 LB: > { %s34_s21 = sadd.s32 1, %s1213_s19  ;;  %p1036_p0 = scmp.ge.s32.totalorder %s1217_s20, 1  ;;  %s1217_s20 = sphi %s1255_s20, %s15_s20   ;;  %s1213_s19 = sphi %s1253_s19, %s1426_s19   ;;  %s1209_s18 = sphi %s1251_s18, %s1425_s18  }
   0x3   : > { %p36_p1 = scmp.ge.s32.totalorder %s34_s21, 5  ;;  %p264_p2 = scmp.lt.s32.totalorder %s1217_s20, 6 }
   0x5   : > { %s1428_s21 = smov (%p36_p1, %s34_s21), 0  ;;  %p265_p3 = pnand %p1036_p0, %p264_p2 }
   0x6   : > { %p325_p4 = scmp.lt.s32.totalorder (!%p265_p3), %s1209_s18, 4 }
   0x7   : > { %268 = sbr.rel (%p265_p3) target bundleno = 398 (0x18e), region = 40 }
   0xc   : > { %v1219_v0 = vmov 0   ;;  %s1430_s18 = smov (!%p325_p4, %s1209_s18), 4  ;;  %vm373_vm0 = vcmask 64512   ;;  %v1220_v33 = vmov 0.0  }
   0xd   : > { %1191 = vset.pattern.permute.xlu0 %v1219_v0  ;;  %1192 = vset.pattern.permute.xlu1 %v1219_v0  ;;  %s1128_s22 = sshll.u32 %s1430_s18, 6  ;;  %s358_s25 = scalar_lea.vmem %s1423_s4, %s1430_s18  ;;  %374 = vst.msk [vmem:[#allocation2] sm:$0xff] %vm373_vm0, %v1220_v33 }
   0xe   : > { %1193 = vset.pattern.permute.xlu2 %v1219_v0  ;;  %s1281_s28 = scalar_lea.vmem %s1420_s1, %s1128_s22  ;;  %s1130_s29 = sshll.u32 %s1430_s18, 7  ;;  %375 = vst.msk [vmem:[#allocation2 + $0x8] sm:$0xff] %vm373_vm0, %v1220_v33 }
   0xf   : > { %v1147_v1 = vld [vmem:[%s1281_s28 + $0x38] sm:$0xff]  ;;  %s1290_s7 = scalar_lea.vmem %s1421_s2, %s1130_s29  ;;  %v1146_v2 = vld [vmem:[%s1281_s28 + $0x30] sm:$0xff]  ;;  %v1145_v5 = vld [vmem:[%s1281_s28 + $0x28] sm:$0xff]  ;;  %s1311_s10 = scalar_lea.vmem %s1419_s0, %s1128_s22  ;;  %376 = vst.msk [vmem:[#allocation2 + $0x10] sm:$0xff] %vm373_vm0, %v1220_v33 }
  0x10   : > { %539 = vmatpush.bf16.msra.mxu0 %v1147_v1  ;;  %1148 = vmatpush.bf16.msra.mxu2 %v1147_v1  ;;  %v624_v3 = vld [vmem:[%s1290_s7] sm:$0xff]  ;;  %v626_v4 = vld [vmem:[%s1290_s7 + $0x10] sm:$0xff]  ;;  %v625_v6 = vld [vmem:[%s1290_s7 + $0x8] sm:$0xff]  ;;  %377 = vst.msk [vmem:[#allocation2 + $0x18] sm:$0xff] %vm373_vm0, %v1220_v33  ;;  %s1043_s11 = sshll.u32 %s1430_s18, 3  ;;  %s1392_s23 = scalar_lea.vmem %s1424_s5, %s1130_s29 }
  0x11   : > { %1149 = vmatpush.bf16.msra.mxu3 %v1147_v1  ;;  %658 = vperm.xlu0 %1191, %v624_v3   ;;  %v1144_v7 = vld [vmem:[%s1281_s28 + $0x20] sm:$0xff]  ;;  %v1143_v8 = vld [vmem:[%s1281_s28 + $0x18] sm:$0xff]  ;;  %v1142_v11 = vld [vmem:[%s1281_s28 + $0x10] sm:$0xff]  ;;  %378 = vst.msk [vmem:[#allocation2 + $0x20] sm:$0xff] %vm373_vm0, %v1220_v33  ;;  %s355_s14 = scalar_lea.vmem %s1422_s3, %s1043_s11 }
  0x12   : > { %668 = vperm.xlu1 %1192, %v626_v4   ;;  %v635_v9 = vld [vmem:[%s1290_s7 + $0x58] sm:$0xff]  ;;  %v1141_v12 = vld [vmem:[%s1281_s28 + $0x8] sm:$0xff]  ;;  %v630_v13 = vld [vmem:[%s1290_s7 + $0x30] sm:$0xff]  ;;  %379 = vst.msk [vmem:[#allocation2 + $0x28] sm:$0xff] %vm373_vm0, %v1220_v33 }
  0x13   : > { %v627_v10 = vld [vmem:[%s1290_s7 + $0x18] sm:$0xff]  ;;  %v629_v14 = vld [vmem:[%s1290_s7 + $0x28] sm:$0xff]  ;;  %v1140_v15 = vld [vmem:[%s1281_s28] sm:$0xff]  ;;  %380 = vst.msk [vmem:[#allocation2 + $0x30] sm:$0xff] %vm373_vm0, %v1220_v33 }
  0x14   : > { %540 = vmatpush.bf16.msra.mxu0 %v1146_v2  ;;  %1150 = vmatpush.bf16.msra.mxu2 %v1146_v2  ;;  %v1132_v16 = vld [vmem:[%s1311_s10] sm:$0xff]  ;;  %v1135_v17 = vld [vmem:[%s1311_s10 + $0x18] sm:$0xff]  ;;  %v638_v19 = vld [vmem:[%s1290_s7 + $0x70] sm:$0xff]  ;;  %381 = vst.msk [vmem:[#allocation2 + $0x38] sm:$0xff] %vm373_vm0, %v1220_v33 }
  0x15   : > { %1151 = vmatpush.bf16.msra.mxu3 %v1146_v2  ;;  %v1139_v18 = vld [vmem:[%s1311_s10 + $0x38] sm:$0xff]  ;;  %v634_v20 = vld [vmem:[%s1290_s7 + $0x50] sm:$0xff]  ;;  %v637_v21 = vld [vmem:[%s1290_s7 + $0x68] sm:$0xff]  ;;  %382 = vst.msk [vmem:[#allocation2 + $0x40] sm:$0xff] %vm373_vm0, %v1220_v33 }
  0x16   : > { %708 = vperm.xlu2 %1193, %v634_v20   ;;  %v628_v22 = vld [vmem:[%s1290_s7 + $0x20] sm:$0xff]  ;;  %v633_v23 = vld [vmem:[%s1290_s7 + $0x48] sm:$0xff]  ;;  %v631_v28 = vld [vmem:[%s1290_s7 + $0x38] sm:$0xff]  ;;  %383 = vst.msk [vmem:[#allocation2 + $0x48] sm:$0xff] %vm373_vm0, %v1220_v33 }
  0x17   : > { %v632_v24 = vld [vmem:[%s1290_s7 + $0x40] sm:$0xff]  ;;  %v1133_v25 = vld [vmem:[%s1311_s10 + $0x8] sm:$0xff]  ;;  %v1134_v29 = vld [vmem:[%s1311_s10 + $0x10] sm:$0xff]  ;;  %384 = vst.msk [vmem:[#allocation2 + $0x50] sm:$0xff] %vm373_vm0, %v1220_v33 }
  0x18   : > { %541 = vmatpush.bf16.msra.mxu0 %v1145_v5  ;;  %1152 = vmatpush.bf16.msra.mxu2 %v1145_v5  ;;  %v1136_v26 = vld [vmem:[%s1311_s10 + $0x20] sm:$0xff]  ;;  %v1137_v30 = vld [vmem:[%s1311_s10 + $0x28] sm:$0xff]  ;;  %v639_v31 = vld [vmem:[%s1290_s7 + $0x78] sm:$0xff]  ;;  %385 = vst.msk [vmem:[#allocation2 + $0x58] sm:$0xff] %vm373_vm0, %v1220_v33 }
  0x19   : > { %1153 = vmatpush.bf16.msra.mxu3 %v1145_v5  ;;  %663 = vperm.xlu0 %1191, %v625_v6   ;;  %v636_v27 = vld [vmem:[%s1290_s7 + $0x60] sm:$0xff]  ;;  %v1138_v32 = vld [vmem:[%s1311_s10 + $0x30] sm:$0xff]  ;;  %386 = vst.msk [vmem:[#allocation2 + $0x60] sm:$0xff] %vm373_vm0, %v1220_v33  ;;  %v392_v41 = vld [vmem:[#allocation2 + $0x8] sm:$0xff] }
  0x1a   : > { %673 = vperm.xlu1 %1192, %v627_v10   ;;  %387 = vst.msk [vmem:[#allocation2 + $0x68] sm:$0xff] %vm373_vm0, %v1220_v33  ;;  %v752_v34 = vld [vmem:[%s355_s14] sm:$0xff]  ;;  %v397_v38 = vld [vmem:[#allocation2 + $0x30] sm:$0xff]  ;;  %v394_v0 = vld [vmem:[#allocation2 + $0x18] sm:$0xff] }
  0x1b   : > { %388 = vst.msk [vmem:[#allocation2 + $0x70] sm:$0xff] %vm373_vm0, %v1220_v33  ;;  %820 = vmatpush.msra.mxu1 %v752_v34  ;;  %v391_v35 = vld [vmem:[#allocation2] sm:$0xff]  ;;  %v398_v50 = vld [vmem:[#allocation2 + $0x38] sm:$0xff]  ;;  %v393_v53 = vld [vmem:[#allocation2 + $0x10] sm:$0xff] }
  0x1c   : > { %542 = vmatpush.bf16.msra.mxu0 %v1144_v7  ;;  %1154 = vmatpush.bf16.msra.mxu2 %v1144_v7  ;;  %389 = vst.msk [vmem:[#allocation2 + $0x78] sm:$0xff] %vm373_vm0, %v1220_v33  ;;  %v399_v62 = vld [vmem:[#allocation2 + $0x40] sm:$0xff] }
  0x1d   : > { %1155 = vmatpush.bf16.msra.mxu3 %v1144_v7  ;;  %v400_v7 = vld [vmem:[#allocation2 + $0x48] sm:$0xff] }
  0x1e   : > { %678 = vperm.xlu2 %1193, %v628_v22  }
  0x20   : > { %543 = vmatpush.bf16.msra.mxu0 %v1143_v8  ;;  %1156 = vmatpush.bf16.msra.mxu2 %v1143_v8 }
  0x21   : > { %1157 = vmatpush.bf16.msra.mxu3 %v1143_v8  ;;  %713 = vperm.xlu0 %1191, %v635_v9   ;;  %v395_v9 = vld [vmem:[#allocation2 + $0x20] sm:$0xff] }
  0x22   : > { %683 = vperm.xlu1 %1192, %v629_v14   ;;  %v405_v39 = vld [vmem:[#allocation2 + $0x70] sm:$0xff] }
  0x23   : > { %v406_v51 = vld [vmem:[#allocation2 + $0x78] sm:$0xff] }
  0x24   : > { %544 = vmatpush.bf16.msra.mxu0 %v1142_v11  ;;  %1158 = vmatpush.bf16.msra.mxu2 %v1142_v11 }
  0x25   : > { %1159 = vmatpush.bf16.msra.mxu3 %v1142_v11 }
  0x26   : > { %718 = vperm.xlu2 %1193, %v636_v27  }
  0x28   : > { %545 = vmatpush.bf16.msra.mxu0 %v1141_v12  ;;  %1160 = vmatpush.bf16.msra.mxu2 %v1141_v12 }
  0x29   : > { %1161 = vmatpush.bf16.msra.mxu3 %v1141_v12  ;;  %688 = vperm.xlu0 %1191, %v630_v13  }
  0x2a   : > { %723 = vperm.xlu1 %1192, %v637_v21  }
  0x2c   : > { %546 = vmatpush.bf16.msra.mxu0 %v1140_v15  ;;  %1162 = vmatpush.bf16.msra.mxu2 %v1140_v15 }
  0x2d   : > { %1163 = vmatpush.bf16.msra.mxu3 %v1140_v15 }
  0x2e   : > { %693 = vperm.xlu2 %1193, %v631_v28  }
  0x2f   : > { %547 = vmatmul.bf16.vlgmr.msra.gmra.mxu0 %v1132_v16  ;;  %562 = vmatmul.bf16.vlgmr.msra.gmra.mxu2 %v1135_v17  ;;  %v401_v17 = vld [vmem:[#allocation2 + $0x50] sm:$0xff] }
  0x30   : > { %582 = vmatmul.bf16.vlgmr.msra.gmra.mxu3 %v1139_v18 }
  0x31   : > { %728 = vperm.xlu0 %1191, %v638_v19   ;;  %1164 = vmatpush.msrb.mxu3 %v752_v34  ;;  %v396_v19 = vld [vmem:[#allocation2 + $0x28] sm:$0xff] }
  0x32   : > { %698 = vperm.xlu1 %1192, %v632_v24  }
  0x36   : > { %733 = vperm.xlu2 %1193, %v639_v31  }
  0x39   : > { %703 = vperm.xlu0 %1191, %v633_v23  }
  0x3f   : > { %552 = vmatmul.bf16.gmra.mxu0 %v1133_v25  ;;  %567 = vmatmul.bf16.gmra.mxu2 %v1136_v26  ;;  %v402_v26 = vld [vmem:[#allocation2 + $0x58] sm:$0xff] }
  0x4f   : > { %557 = vmatmul.bf16.gmra.mxu0 %v1134_v29  ;;  %572 = vmatmul.bf16.gmra.mxu2 %v1137_v30 }
  0x5f   : > { %577 = vmatmul.bf16.gmra.mxu2 %v1138_v32 }
  0x70   : > { %v709_v11 = vpop.permute.xlu2 %708 }
  0x78   : > { %v679_v23 = vpop.permute.xlu2 %678 }
  0x83   : > { %v659_v44 = vpop.permute.xlu0 %658 }
  0x84   : > { %v669_v2 = vpop.permute.xlu1 %668 }
  0x8b   : > { %v664_v59 = vpop.permute.xlu0 %663 }
  0x8c   : > { %v674_v14 = vpop.permute.xlu1 %673 }
  0x93   : > { %v714_v29 = vpop.permute.xlu0 %713 }
  0x94   : > { %v684_v32 = vpop.permute.xlu1 %683 }
  0xac   : > { %v548_v36 = vpop.f32.mrf.mxu0 }
  0xad   : > { %v588_v37 = vadd.f32 %v548_v36, %v391_v35  ;;  %v403_v35 = vld [vmem:[#allocation2 + $0x60] sm:$0xff]  ;;  %v719_v36 = vpop.permute.xlu2 %718 }
  0xaf   : > { %605 = vst.msk [vmem:[#allocation2] sm:$0xff] %vm373_vm0, %v588_v37 }
  0xb2   : > { %v563_v40 = vpop.f32.mrf.mxu2 }
  0xb3   : > { %v594_v42 = vadd.f32 %v563_v40, %v397_v38  ;;  %v583_v43 = vpop.f32.mrf.mxu3 }
  0xb4   : > { %v550_v45 = vpop.f32.mrf.mxu0  ;;  %v602_v46 = vadd.f32 %v583_v43, %v405_v39 }
  0xb5   : > { %611 = vst.msk [vmem:[#allocation2 + $0x30] sm:$0xff] %vm373_vm0, %v594_v42  ;;  %v589_v47 = vadd.f32 %v550_v45, %v392_v41  ;;  %v689_v42 = vpop.permute.xlu0 %688  ;;  %v724_v45 = vpop.permute.xlu1 %723 }
  0xb6   : > { %619 = vst.msk [vmem:[#allocation2 + $0x70] sm:$0xff] %vm373_vm0, %v602_v46  ;;  %v640_v48 = vld [vmem:[#allocation2] sm:$0xff] }
  0xb7   : > { %606 = vst.msk [vmem:[#allocation2 + $0x8] sm:$0xff] %vm373_vm0, %v589_v47  ;;  %v736_v49 = vmul.f32 %v659_v44, %v640_v48  ;;  %v404_v44 = vld [vmem:[#allocation2 + $0x68] sm:$0xff]  ;;  %v694_v48 = vpop.permute.xlu2 %693 }
  0xb9   : > { %1110 = vmatmul.msk.f32.vlgmr.msra.gmra.mxu1 %vm373_vm0, %v736_v49 }
  0xba   : > { %v565_v52 = vpop.f32.mrf.mxu2 }
  0xbb   : > { %v595_v54 = vadd.f32 %v565_v52, %v398_v50  ;;  %v585_v55 = vpop.f32.mrf.mxu3 }
  0xbc   : > { %v553_v56 = vpop.f32.mrf.mxu0  ;;  %v603_v57 = vadd.f32 %v585_v55, %v406_v51  ;;  %v646_v40 = vld [vmem:[#allocation2 + $0x30] sm:$0xff] }
  0xbd   : > { %612 = vst.msk [vmem:[#allocation2 + $0x38] sm:$0xff] %vm373_vm0, %v595_v54  ;;  %v590_v58 = vadd.f32 %v553_v56, %v393_v53  ;;  %v742_v43 = vmul.f32 %v689_v42, %v646_v40  ;;  %v729_v53 = vpop.permute.xlu0 %728  ;;  %v699_v54 = vpop.permute.xlu1 %698 }
  0xbe   : > { %v641_v60 = vld [vmem:[#allocation2 + $0x8] sm:$0xff]  ;;  %620 = vst.msk [vmem:[#allocation2 + $0x78] sm:$0xff] %vm373_vm0, %v603_v57 }
  0xbf   : > { %607 = vst.msk [vmem:[#allocation2 + $0x10] sm:$0xff] %vm373_vm0, %v590_v58  ;;  %v737_v61 = vmul.f32 %v664_v59, %v641_v60  ;;  %v654_v59 = vld [vmem:[#allocation2 + $0x70] sm:$0xff] }
  0xc1   : > { %1111 = vmatmul.msk.f32.gmra.mxu1 %vm373_vm0, %v737_v61  ;;  %v750_v61 = vmul.f32 %v729_v53, %v654_v59 }
  0xc2   : > { %v568_v63 = vpop.f32.mrf.mxu2 }
  0xc3   : > { %v596_v1 = vadd.f32 %v568_v63, %v399_v62 }
  0xc4   : > { %v555_v3 = vpop.f32.mrf.mxu0  ;;  %v647_v49 = vld [vmem:[#allocation2 + $0x38] sm:$0xff] }
  0xc5   : > { %613 = vst.msk [vmem:[#allocation2 + $0x40] sm:$0xff] %vm373_vm0, %v596_v1  ;;  %v591_v4 = vadd.f32 %v555_v3, %v394_v0  ;;  %v743_v52 = vmul.f32 %v694_v48, %v647_v49  ;;  %v704_v62 = vpop.permute.xlu0 %703  ;;  %v734_v0 = vpop.permute.xlu2 %733  ;;  %v655_v1 = vld [vmem:[#allocation2 + $0x78] sm:$0xff]  ;;  %v1194_v3 = vld [vmem:[%s358_s25] ss:$0 sm:$0xff] }
  0xc6   : > { %v642_v5 = vld [vmem:[#allocation2 + $0x10] sm:$0xff] }
  0xc7   : > { %608 = vst.msk [vmem:[#allocation2 + $0x18] sm:$0xff] %vm373_vm0, %v591_v4  ;;  %v738_v6 = vmul.f32 %v669_v2, %v642_v5  ;;  %v751_v2 = vmul.f32 %v734_v0, %v655_v1 }
  0xc9   : > { %1112 = vmatmul.msk.f32.gmra.mxu1 %vm373_vm0, %v738_v6 }
  0xca   : > { %v570_v8 = vpop.f32.mrf.mxu2 }
  0xcb   : > { %v597_v10 = vadd.f32 %v570_v8, %v400_v7 }
  0xcc   : > { %v558_v12 = vpop.f32.mrf.mxu0  ;;  %v648_v55 = vld [vmem:[#allocation2 + $0x40] sm:$0xff] }
  0xcd   : > { %614 = vst.msk [vmem:[#allocation2 + $0x48] sm:$0xff] %vm373_vm0, %v597_v10  ;;  %v592_v13 = vadd.f32 %v558_v12, %v395_v9  ;;  %v744_v58 = vmul.f32 %v699_v54, %v648_v55 }
  0xce   : > { %v643_v15 = vld [vmem:[#allocation2 + $0x18] sm:$0xff] }
  0xcf   : > { %609 = vst.msk [vmem:[#allocation2 + $0x20] sm:$0xff] %vm373_vm0, %v592_v13  ;;  %v739_v16 = vmul.f32 %v674_v14, %v643_v15 }
  0xd1   : > { %1113 = vmatmul.msk.f32.gmra.mxu1 %vm373_vm0, %v739_v16 }
  0xd2   : > { %v573_v18 = vpop.f32.mrf.mxu2 }
  0xd3   : > { %v598_v20 = vadd.f32 %v573_v18, %v401_v17 }
  0xd4   : > { %v560_v21 = vpop.f32.mrf.mxu0  ;;  %v649_v60 = vld [vmem:[#allocation2 + $0x48] sm:$0xff] }
  0xd5   : > { %615 = vst.msk [vmem:[#allocation2 + $0x50] sm:$0xff] %vm373_vm0, %v598_v20  ;;  %v593_v22 = vadd.f32 %v560_v21, %v396_v19  ;;  %v745_v63 = vmul.f32 %v704_v62, %v649_v60 }
  0xd6   : > { %v644_v24 = vld [vmem:[#allocation2 + $0x20] sm:$0xff] }
  0xd7   : > { %610 = vst.msk [vmem:[#allocation2 + $0x28] sm:$0xff] %vm373_vm0, %v593_v22  ;;  %v740_v25 = vmul.f32 %v679_v23, %v644_v24 }
  0xd9   : > { %1114 = vmatmul.msk.f32.gmra.mxu1 %vm373_vm0, %v740_v25 }
  0xda   : > { %v575_v27 = vpop.f32.mrf.mxu2 }
  0xdb   : > { %v599_v28 = vadd.f32 %v575_v27, %v402_v26 }
  0xdc   : > { %v650_v30 = vld [vmem:[#allocation2 + $0x50] sm:$0xff] }
  0xdd   : > { %616 = vst.msk [vmem:[#allocation2 + $0x58] sm:$0xff] %vm373_vm0, %v599_v28  ;;  %v746_v31 = vmul.f32 %v709_v11, %v650_v30 }
  0xde   : > { %v645_v33 = vld [vmem:[#allocation2 + $0x28] sm:$0xff] }
  0xdf   : > { %1120 = vmatmul.msk.f32.vlgmr.msrb.gmra.mxu3 %vm373_vm0, %v746_v31  ;;  %v741_v34 = vmul.f32 %v684_v32, %v645_v33 }
  0xe1   : > { %1115 = vmatmul.msk.f32.gmra.mxu1 %vm373_vm0, %v741_v34 }
  0xe2   : > { %v578_v37 = vpop.f32.mrf.mxu2 }
  0xe3   : > { %v600_v38 = vadd.f32 %v578_v37, %v403_v35 }
  0xe4   : > { %v651_v39 = vld [vmem:[#allocation2 + $0x58] sm:$0xff] }
  0xe5   : > { %617 = vst.msk [vmem:[#allocation2 + $0x60] sm:$0xff] %vm373_vm0, %v600_v38  ;;  %v747_v41 = vmul.f32 %v714_v29, %v651_v39 }
  0xe7   : > { %1121 = vmatmul.msk.f32.gmra.mxu3 %vm373_vm0, %v747_v41 }
  0xe9   : > { %1116 = vmatmul.msk.f32.gmra.mxu1 %vm373_vm0, %v742_v43 }
  0xea   : > { %v580_v46 = vpop.f32.mrf.mxu2 }
  0xeb   : > { %v601_v47 = vadd.f32 %v580_v46, %v404_v44 }
  0xec   : > { %v652_v50 = vld [vmem:[#allocation2 + $0x60] sm:$0xff] }
  0xed   : > { %618 = vst.msk [vmem:[#allocation2 + $0x68] sm:$0xff] %vm373_vm0, %v601_v47  ;;  %v748_v51 = vmul.f32 %v719_v36, %v652_v50 }
  0xef   : > { %1122 = vmatmul.msk.f32.gmra.mxu3 %vm373_vm0, %v748_v51 }
  0xf1   : > { %1117 = vmatmul.msk.f32.gmra.mxu1 %vm373_vm0, %v743_v52 }
  0xf4   : > { %v653_v56 = vld [vmem:[#allocation2 + $0x68] sm:$0xff] }
  0xf5   : > { %v749_v57 = vmul.f32 %v724_v45, %v653_v56 }
  0xf7   : > { %1123 = vmatmul.msk.f32.gmra.mxu3 %vm373_vm0, %v749_v57 }
  0xf9   : > { %1118 = vmatmul.msk.f32.gmra.mxu1 %vm373_vm0, %v744_v58 }
  0xff   : > { %1124 = vmatmul.msk.f32.gmra.mxu3 %vm373_vm0, %v750_v61 }
 0x101   : > { %1119 = vmatmul.msk.f32.gmra.mxu1 %vm373_vm0, %v745_v63 }
 0x107   : > { %1125 = vmatmul.msk.f32.gmra.mxu3 %vm373_vm0, %v751_v2 }
 0x136   : > { %v822_v4 = vpop.f32.mrf.mxu1 }
 0x137   : > { %v823_v5 = vadd.f32 %v1194_v3, %v822_v4 }
 0x139   : > { %870 = vst [vmem:[%s1392_s23] sm:$0xff] %v823_v5 }
 0x13e   : > { %v825_v6 = vpop.f32.mrf.mxu1 }
 0x13f   : > { %v826_v7 = vadd.f32 %v1194_v3, %v825_v6 }
 0x141   : > { %871 = vst [vmem:[%s1392_s23 + $0x8] sm:$0xff] %v826_v7 }
 0x146   : > { %v828_v8 = vpop.f32.mrf.mxu1 }
 0x147   : > { %v829_v9 = vadd.f32 %v1194_v3, %v828_v8 }
 0x149   : > { %872 = vst [vmem:[%s1392_s23 + $0x10] sm:$0xff] %v829_v9 }
 0x14e   : > { %v831_v10 = vpop.f32.mrf.mxu1 }
 0x14f   : > { %v832_v11 = vadd.f32 %v1194_v3, %v831_v10 }
 0x151   : > { %873 = vst [vmem:[%s1392_s23 + $0x18] sm:$0xff] %v832_v11 }
 0x156   : > { %v834_v12 = vpop.f32.mrf.mxu1 }
 0x157   : > { %v835_v13 = vadd.f32 %v1194_v3, %v834_v12 }
 0x159   : > { %874 = vst [vmem:[%s1392_s23 + $0x20] sm:$0xff] %v835_v13 }
 0x15e   : > { %v837_v14 = vpop.f32.mrf.mxu1 }
 0x15f   : > { %v838_v15 = vadd.f32 %v1194_v3, %v837_v14 }
 0x161   : > { %875 = vst [vmem:[%s1392_s23 + $0x28] sm:$0xff] %v838_v15 }
 0x162   : > { %v852_v16 = vpop.f32.mrf.mxu3 }
 0x163   : > { %v853_v17 = vadd.f32 %v1194_v3, %v852_v16 }
 0x165   : > { %880 = vst [vmem:[%s1392_s23 + $0x50] sm:$0xff] %v853_v17 }
 0x166   : > { %v840_v18 = vpop.f32.mrf.mxu1 }
 0x167   : > { %v841_v19 = vadd.f32 %v1194_v3, %v840_v18 }
 0x169   : > { %876 = vst [vmem:[%s1392_s23 + $0x30] sm:$0xff] %v841_v19 }
 0x16a   : > { %v855_v20 = vpop.f32.mrf.mxu3 }
 0x16b   : > { %v856_v21 = vadd.f32 %v1194_v3, %v855_v20 }
 0x16d   : > { %881 = vst [vmem:[%s1392_s23 + $0x58] sm:$0xff] %v856_v21 }
 0x16e   : > { %v843_v22 = vpop.f32.mrf.mxu1 }
 0x16f   : > { %v844_v23 = vadd.f32 %v1194_v3, %v843_v22 }
 0x171   : > { %877 = vst [vmem:[%s1392_s23 + $0x38] sm:$0xff] %v844_v23 }
 0x172   : > { %v858_v24 = vpop.f32.mrf.mxu3 }
 0x173   : > { %v859_v25 = vadd.f32 %v1194_v3, %v858_v24 }
 0x175   : > { %882 = vst [vmem:[%s1392_s23 + $0x60] sm:$0xff] %v859_v25 }
 0x176   : > { %v846_v26 = vpop.f32.mrf.mxu1 }
 0x177   : > { %v847_v27 = vadd.f32 %v1194_v3, %v846_v26 }
 0x179   : > { %878 = vst [vmem:[%s1392_s23 + $0x40] sm:$0xff] %v847_v27 }
 0x17a   : > { %v861_v28 = vpop.f32.mrf.mxu3 }
 0x17b   : > { %v862_v29 = vadd.f32 %v1194_v3, %v861_v28 }
 0x17d   : > { %883 = vst [vmem:[%s1392_s23 + $0x68] sm:$0xff] %v862_v29 }
 0x17e   : > { %v849_v30 = vpop.f32.mrf.mxu1 }
 0x17f   : > { %v850_v31 = vadd.f32 %v1194_v3, %v849_v30 }
 0x181   : > { %879 = vst [vmem:[%s1392_s23 + $0x48] sm:$0xff] %v850_v31 }
 0x182   : > { %v864_v32 = vpop.f32.mrf.mxu3 }
 0x183   : > { %v865_v33 = vadd.f32 %v1194_v3, %v864_v32 }
 0x185   : > { %884 = vst [vmem:[%s1392_s23 + $0x70] sm:$0xff] %v865_v33 }
 0x18a   : > { %v867_v34 = vpop.f32.mrf.mxu3 }
 0x18b   : > { %v868_v35 = vadd.f32 %v1194_v3, %v867_v34 }
 0x18d   : > { %885 = vst [vmem:[%s1392_s23 + $0x78] sm:$0xff] %v868_v35 }
 0x18e PF: > { %s15_s20 = sadd.s32 1, %s1217_s20   ;;  %s1425_s18 = smov %s1213_s19 }
 0x18f   : > { %p12_p5 = scmp.ge.s32.totalorder %s15_s20, 7   ;;  %s1426_s19 = smov %s1428_s21 }
 0x191   :  { %14 = sbr.rel (!%p12_p5) target bundleno = 2 (0x2), region = 91 }

</bundles_post_ra>
